<compile_context>
chip_gen: v7x
topology: tpu7x:2x2x1
jax: 0.10.0
libtpu: 0.0.40
codegen_flags: <defaults>
</compile_context>

<pallas_src>
import math

import jax
import jax.numpy as jnp
from jax.experimental import pallas as pl
from jax.experimental.pallas import tpu as pltpu


# ----------------------------------------------------------------------------
# Primary path: zero-copy pass-through (output aliases input).
# ----------------------------------------------------------------------------
def _passthrough_kernel(x_hbm_ref, o_hbm_ref, flag_ref):
    # Output is aliased to the input (input_output_aliases={0: 0}), so the
    # bytes are already exactly where they need to be: nothing to move.
    # The tiny SMEM scratch write just keeps the kernel body non-empty.
    del x_hbm_ref, o_hbm_ref
    flag_ref[0] = jnp.int32(0)


def unflatten(x, target_shape):
    """Pallas equivalent of UnFlatten(target_shape).forward(x).

    Zero-copy: the pallas_call output aliases the input HBM buffer; the
    reshape itself is metadata-only JAX glue around the call.
    """
    B = x.shape[0]
    n = math.prod(target_shape)
    assert math.prod(x.shape[1:]) == n, (x.shape, target_shape)

    passed = pl.pallas_call(
        _passthrough_kernel,
        out_shape=jax.ShapeDtypeStruct(x.shape, x.dtype),
        in_specs=[pl.BlockSpec(memory_space=pl.ANY)],   # stay in HBM, no auto-DMA
        out_specs=pl.BlockSpec(memory_space=pl.ANY),
        scratch_shapes=[pltpu.SMEM((1,), jnp.int32)],
        input_output_aliases={0: 0},                    # output buffer == input buffer
    )(x)
    return jnp.reshape(passed, (B, *target_shape))      # metadata-only


# ----------------------------------------------------------------------------
# Optional path: materialized copy, tiled lane-dense and pipelined.
# ----------------------------------------------------------------------------
def _copy_kernel(x_ref, o_ref):
    o_ref[...] = x_ref[...]


def unflatten_copy(x, target_shape, *, max_block_rows=1024):
    """Like `unflatten`, but materializes a fresh output buffer via a tiled,
    lane-dense HBM->VMEM->HBM copy (use only when a real copy is wanted)."""
    B = x.shape[0]
    n = math.prod(target_shape)
    total = B * n
    assert math.prod(x.shape[1:]) == n, (x.shape, target_shape)

    itemsize = jnp.dtype(x.dtype).itemsize
    sub = {4: 8, 2: 16, 1: 32}.get(itemsize, 8)          # sublane packing factor

    # Lane-dense 2-D view (rows, lanes): lanes a multiple of 128, rows a
    # multiple of the sublane packing -> full vreg utilization, unmasked vst.
    lanes = None
    for cand in (2048, 1024, 512, 256, 128):
        if total % cand == 0 and (total // cand) % sub == 0:
            lanes = cand
            break
    if lanes is None:
        # TODO(synk): ragged totals (not a multiple of 128*sub) fall back to the
        # metadata-only reshape; there is no data movement to express anyway.
        return jnp.reshape(x, (B, *target_shape))
    rows = total // lanes

    # Block rows: a multiple of `sub` that divides `rows`, sized so the double
    # buffered footprint (2x in + 2x out blocks) stays under ~8 MiB (safe on
    # the v7x 64 MiB / 32 MiB-scoped VMEM as well as v5e/v6e).
    budget_bytes = 8 * 1024 * 1024
    rows_by_vmem = max(sub, budget_bytes // (4 * lanes * itemsize) // sub * sub)
    tb = min(rows, max_block_rows, rows_by_vmem)
    while tb > sub and rows % tb != 0:
        tb -= sub
    if rows % tb != 0:        # always divides by construction; belt & braces
        tb = rows

    flat = jnp.reshape(x, (rows, lanes))                 # metadata-only
    out_flat = pl.pallas_call(
        _copy_kernel,
        out_shape=jax.ShapeDtypeStruct((rows, lanes), x.dtype),
        grid=(rows // tb,),
        # Contiguous lane-major stripes: block the leading (row) axis only.
        in_specs=[pl.BlockSpec((tb, lanes), lambda i: (i, 0))],
        out_specs=pl.BlockSpec((tb, lanes), lambda i: (i, 0)),
        compiler_params=pltpu.CompilerParams(
            dimension_semantics=("parallel",),           # 2-TC sharding on v7x
            vmem_limit_bytes=32 * 1024 * 1024,
        ),
    )(flat)
    return jnp.reshape(out_flat, (B, *target_shape))     # metadata-only


if __name__ == "__main__":
    key = jax.random.PRNGKey(0)

    # Shapes consistent with the module: batch=2, target_shape=(4, 16, 16),
    # i.e. a flat latent of size 4*16*16 = 1024 un-flattened to NCHW.
    B = 2
    target_shape = (4, 16, 16)
    n = 4 * 16 * 16

    x = jax.random.normal(key, (B, n), dtype=jnp.float32)
    ref = jnp.reshape(x, (B, *target_shape))

    # Tiled, lane-dense copy variant (for when a materialized copy is wanted).
    out_copy = jax.block_until_ready(unflatten_copy(x, target_shape))
    assert out_copy.shape == (B, *target_shape), out_copy.shape
    assert out_copy.dtype == x.dtype
    assert bool(jnp.array_equal(out_copy, ref))

    # Primary zero-copy aliased pass-through (run last; its pallas_call input
    # buffer is aliased to the output).
    out = jax.block_until_ready(unflatten(x, target_shape))
    assert out.shape == (B, *target_shape), out.shape
    assert out.dtype == x.dtype
    assert bool(jnp.array_equal(out, ref))

    print("KERNEL_OK")
</pallas_src>

<mosaic_0001>
module attributes {stable_mosaic.version = 11 : i64} {
  func.func @_copy_kernel(%arg0: i32, %arg1: memref<8x256xf32, #tpu.memory_space<vmem>>, %arg2: memref<8x256xf32, #tpu.memory_space<vmem>>) attributes {dimension_semantics = [#tpu.dimension_semantics<parallel>], iteration_bounds = array<i64: 1>, scalar_prefetch = 0 : i64, scratch_operands = 0 : i64, tpu.core_type = #tpu.core_type<tc>, window_params = [{transform_indices = @transform_0, window_bounds = array<i64: 8, 256>}, {transform_indices = @transform_1, window_bounds = array<i64: 8, 256>}]} {
    %c0 = arith.constant 0 : index
    %c0_0 = arith.constant 0 : index
    %0 = vector.load %arg1[%c0, %c0_0] : memref<8x256xf32, #tpu.memory_space<vmem>>, vector<8x256xf32>
    %c0_1 = arith.constant 0 : index
    %c0_2 = arith.constant 0 : index
    %1 = vector.load %arg2[%c0_1, %c0_2] : memref<8x256xf32, #tpu.memory_space<vmem>>, vector<8x256xf32>
    tpu.vector_store %arg2[%c0_1, %c0_2], %0 {strides = array<i32>} : memref<8x256xf32, #tpu.memory_space<vmem>>, vector<8x256xf32>,
    return
  }
  func.func @transform_0(%arg0: i32) -> (i32, i32) {
    %c0_i32 = arith.constant 0 : i32
    %c0_i32_0 = arith.constant 0 : i32
    return %arg0, %c0_i32 : i32, i32
  }
  func.func @transform_1(%arg0: i32) -> (i32, i32) {
    %c0_i32 = arith.constant 0 : i32
    %c0_i32_0 = arith.constant 0 : i32
    return %arg0, %c0_i32 : i32, i32
  }
}

</mosaic_0001>

<bundles_post_ra>
// kernel: tpu_custom_call.1
= control target key start
LH: loop header
LB: loop body
LE: loop exit
PB: predicated region body
PF: predicated region fallthrough
CT: control target
= control target key end

     0   :  { %6 = vsyncpa [#allocation3], 0  ;;  %s126_s0 = inlined_call_operand.hbm [shape: f32[8,256], index: 0, kind: input, shape index: {}]   ;;  %s127_s1 = inlined_call_operand.hbm [shape: f32[8,256], index: 1, kind: output, shape index: {}]  }
   0x1   :  { %7 = vsyncpa [#allocation4], 0  ;;  %s90_s6 = smov [#allocation2]   ;;  %s42_s10 = scalar_lea.hbm %s126_s0, 256 }
   0x2   :  { %s14_s7 = sshll.u32 %s90_s6, 4  ;;  %p43_p0 = scmp.ne.s32.totalorder %s126_s0, %s42_s10  ;;  %s15_s7 = int_to_ptr.vmem [resolvable:$true] %s14_s7 }
   0x3   :  { %p46_p1 = scmp.lt.u32.totalorder %s42_s10, %s126_s0 }
   0x5   :  { %p48_p2 = pnand %p46_p1, %p43_p0 }
   0x7   :  { %51 = shalt.err (!%p48_p2)
}
   0x8   :  { %s52_s15 = scalar_lea.vmem %s15_s7, 256  ;;  %p57_p4 = scmp.lt.s32.totalorder %s15_s7, %s15_s7 }
   0x9   :  { %p53_p3 = scmp.ne.s32.totalorder %s15_s7, %s52_s15  ;;  %p58_p5 = scmp.lt.s32.totalorder %s52_s15, %s52_s15 }
   0xb   :  { %p59_p6 = por %p58_p5, %p57_p4 }
   0xd   :  { %p60_p7 = pnand %p59_p6, %p53_p3 }
   0xf   :  { %63 = shalt.err (!%p60_p7)
}
  0x10   :  { %17 = dma.hbm_to_vmem [thread:$0]  %s126_s0, 256, %s15_s7, [#allocation3]  }
  0x11   :  { %86 = dma.done.wait [#allocation3], 256  }
  0x12   :  { %87 = vsyncadd [#allocation3], 4294967040  ;;  %s91_s18 = smov [#allocation5]   ;;  %v21_v0 = vld [vmem:[#allocation2] sm:$0xff]  ;;  %v22_v1 = vld [vmem:[#allocation2 + $0x8] sm:$0xff] }
  0x13   :  { %s31_s19 = sshll.u32 %s91_s18, 4  ;;  %23 = vst [vmem:[#allocation5] sm:$0xff] %v21_v0  ;;  %24 = vst [vmem:[#allocation5 + $0x8] sm:$0xff] %v22_v1  ;;  %s32_s19 = int_to_ptr.vmem [resolvable:$true] %s31_s19 }
  0x14   :  { %s64_s20 = scalar_lea.vmem %s32_s19, 256  ;;  %p69_p9 = scmp.lt.s32.totalorder %s32_s19, %s32_s19 }
  0x15   :  { %p65_p8 = scmp.ne.s32.totalorder %s32_s19, %s64_s20  ;;  %p70_p10 = scmp.lt.s32.totalorder %s64_s20, %s64_s20 }
  0x17   :  { %p71_p11 = por %p70_p10, %p69_p9 }
  0x19   :  { %p72_p12 = pnand %p71_p11, %p65_p8 }
  0x1b   :  { %75 = shalt.err (!%p72_p12)
}
  0x1c   :  { %s76_s0 = scalar_lea.hbm %s127_s1, 256 }
  0x1d   :  { %p77_p13 = scmp.ne.s32.totalorder %s127_s1, %s76_s0  ;;  %p80_p0 = scmp.lt.u32.totalorder %s76_s0, %s127_s1 }
  0x1f   :  { %p82_p1 = pnand %p80_p0, %p77_p13 }
  0x21   :  { %85 = shalt.err (!%p82_p1)
}
  0x22   :  { %34 = dma.vmem_to_hbm [thread:$0]  %s32_s19, 256, %s127_s1, [#allocation4]  }
  0x23   :  { %88 = dma.done.wait [#allocation4], 256  }
  0x24   :  { %89 = vsyncadd [#allocation4], 4294967040 }
  0x25   :  { %38 = vsyncpa [#allocation3], 1 }
  0x26   :  { %39 = vsyncpa [#allocation4], 1 }

</bundles_post_ra>
